<compile_context>
chip_gen: v7x
topology: tpu7x:2x2x1
jax: 0.10.0
libtpu: 0.0.40
codegen_flags: <defaults>
</compile_context>

<pallas_src>
import functools

import jax
import jax.numpy as jnp
from jax import lax
from jax.experimental import pallas as pl
from jax.experimental.pallas import tpu as pltpu

LN_EPS = 1e-5  # PyTorch nn.LayerNorm default


def _round_up(x, m):
    return ((x + m - 1) // m) * m


def _vmem_capacity_bytes():
    try:
        return int(pltpu.get_tpu_info().vmem_capacity_bytes)
    except Exception:
        return 64 * 1024 * 1024  # conservative fallback (v7x per-core VMEM)


def _layernorm_relu(h, gamma, beta, inv_n):
    """LayerNorm + ReLU over last axis; statistics over the TRUE feature count.

    Padded lanes of `h` are exactly zero (zero-padded weights/biases upstream),
    so plain row-sums only see true lanes and no per-lane mask is needed.
    gamma/beta are zero in padded lanes, so output padded lanes stay zero.
    """
    mean = jnp.sum(h, axis=-1, keepdims=True) * inv_n
    ex2 = jnp.sum(h * h, axis=-1, keepdims=True) * inv_n
    var = jnp.maximum(ex2 - mean * mean, 0.0)
    y = (h - mean) * lax.rsqrt(var + LN_EPS) * gamma + beta
    return jnp.maximum(y, 0.0)


def mlp_kernel(x_ref,
               w1_ref, b1_ref, g1_ref, bt1_ref,
               w2_ref, b2_ref, g2_ref, bt2_ref,
               w3_ref, b3_ref,
               out_ref, *, true_hidden):
    inv_n = 1.0 / float(true_hidden)

    # Streamed batch tile; cast to bf16 on-chip (cheap VPU work, hidden under MXU).
    x = x_ref[...].astype(jnp.bfloat16)

    # Block 1: Linear -> LayerNorm -> ReLU -> (Dropout = identity in eval)
    h = jnp.dot(x, w1_ref[...], preferred_element_type=jnp.float32) + b1_ref[...]
    h = _layernorm_relu(h, g1_ref[...], bt1_ref[...], inv_n)

    # Block 2: Linear -> LayerNorm -> ReLU -> (Dropout = identity in eval)
    h = jnp.dot(h.astype(jnp.bfloat16), w2_ref[...],
                preferred_element_type=jnp.float32) + b2_ref[...]
    h = _layernorm_relu(h, g2_ref[...], bt2_ref[...], inv_n)

    # Final Linear
    out = jnp.dot(h.astype(jnp.bfloat16), w3_ref[...],
                  preferred_element_type=jnp.float32) + b3_ref[...]
    out_ref[...] = out.astype(out_ref.dtype)


def pack_params(params):
    """One-time weight packing: pad to lane-dense shapes + bf16 weights.

    Call once (model load time) and reuse the result across forward calls; this
    removes a read-f32/write-bf16 HBM pass over the weights from every forward.
    """
    input_dim, hidden = params["w1"].shape
    output_dim = params["w3"].shape[1]
    Dp = _round_up(input_dim, 128)
    Hp = _round_up(hidden, 128)
    Op = _round_up(output_dim, 128)

    def pad2(a, rows, cols, dtype=None):
        if dtype is not None:
            a = a.astype(dtype)
        return jnp.pad(a, ((0, rows - a.shape[0]), (0, cols - a.shape[1])))

    return {
        "w1": pad2(params["w1"], Dp, Hp, jnp.bfloat16),
        "b1": pad2(params["b1"], 1, Hp),
        "g1": pad2(params["g1"], 1, Hp),
        "bt1": pad2(params["bt1"], 1, Hp),
        "w2": pad2(params["w2"], Hp, Hp, jnp.bfloat16),
        "b2": pad2(params["b2"], 1, Hp),
        "g2": pad2(params["g2"], 1, Hp),
        "bt2": pad2(params["bt2"], 1, Hp),
        "w3": pad2(params["w3"], Hp, Op, jnp.bfloat16),
        "b3": pad2(params["b3"], 1, Op),
        "dims": (int(input_dim), int(hidden), int(output_dim), Dp, Hp, Op),
    }


def _choose_tb(B, Dp, Op, resident_alloc_bytes, vmem_budget_bytes, out_bytes):
    """Pick the batch tile: fit VMEM, prefer >=2 grid steps (v7x megacore),
    then minimize padded rows + per-step overhead."""
    b8 = _round_up(B, 8)
    best_key, best_tb = None, 8
    for tb in (512, 256, 128, 64, 32, 16, 8):
        if tb > b8:
            continue
        bp = _round_up(B, tb)
        steps = bp // tb
        stream = 2 * (tb * Dp * 4 + tb * Op * out_bytes)  # x assumed f32 (worst case)
        if resident_alloc_bytes + stream > vmem_budget_bytes and tb != 8:
            continue
        single_step_penalty = 1 if (steps < 2 and B >= 16) else 0
        cost = bp + 64 * steps  # ~0.35us/step amortized as ~64 rows of work
        key = (single_step_penalty, cost, -tb)
        if best_key is None or key < best_key:
            best_key, best_tb = key, tb
    return best_tb


def mlp_forward(x, packed, out_dtype=jnp.float32):
    """x: (B, input_dim) float32.  packed: output of pack_params()."""
    B, input_dim = x.shape
    true_in, true_hidden, true_out, Dp, Hp, Op = packed["dims"]
    assert input_dim == true_in

    vmem_budget = int(0.9 * _vmem_capacity_bytes())
    out_bytes = jnp.dtype(out_dtype).itemsize

    # Resident (constant-index) VMEM blocks: bf16 weights + f32 bias/LN params
    # ((1, N) params occupy 8 sublanes each in VMEM).
    resident_bytes = (2 * (Dp * Hp + Hp * Hp + Hp * Op)
                      + 8 * 4 * (7 * Hp + Op))

    def run(single_buffer_residents):
        buf_factor = 1 if single_buffer_residents else 2
        resident_alloc = buf_factor * resident_bytes
        TB = _choose_tb(B, Dp, Op, resident_alloc, vmem_budget, out_bytes)
        Bp = _round_up(B, TB)

        # Activation path: skip the extra HBM pad/cast pass when no padding is
        # needed; the kernel casts to bf16 on-chip either way.
        if input_dim == Dp and B == Bp:
            x_in = x
            x_bytes = x.dtype.itemsize
        else:
            x_in = jnp.pad(x.astype(jnp.bfloat16),
                           ((0, Bp - B), (0, Dp - input_dim)))
            x_bytes = 2

        stream_bytes = 2 * (TB * Dp * x_bytes + TB * Op * out_bytes)
        needed = resident_alloc + stream_bytes + (4 << 20)  # + internal scratch
        vmem_limit = min(max(32 * 1024 * 1024, int(1.15 * needed)), vmem_budget)

        def resident(shape):
            idx = lambda i, _nd=len(shape): (0,) * _nd
            if single_buffer_residents:
                return pl.BlockSpec(shape, idx, pipeline_mode=pl.Buffered(1))
            return pl.BlockSpec(shape, idx)

        in_specs = [
            pl.BlockSpec((TB, Dp), lambda i: (i, 0)),   # streamed x tile
            resident((Dp, Hp)), resident((1, Hp)), resident((1, Hp)), resident((1, Hp)),
            resident((Hp, Hp)), resident((1, Hp)), resident((1, Hp)), resident((1, Hp)),
            resident((Hp, Op)), resident((1, Op)),
        ]
        out_specs = pl.BlockSpec((TB, Op), lambda i: (i, 0))

        flops = 2 * B * (true_in * true_hidden + true_hidden * true_hidden
                         + true_hidden * true_out)
        bytes_accessed = (Bp * Dp * x_bytes
                          + 2 * (Dp * Hp + Hp * Hp + Hp * Op)
                          + Bp * Op * out_bytes)

        return pl.pallas_call(
            functools.partial(mlp_kernel, true_hidden=true_hidden),
            out_shape=jax.ShapeDtypeStruct((Bp, Op), out_dtype),
            grid=(Bp // TB,),
            in_specs=in_specs,
            out_specs=out_specs,
            compiler_params=pltpu.CompilerParams(
                dimension_semantics=("parallel",),
                vmem_limit_bytes=vmem_limit),
            cost_estimate=pl.CostEstimate(
                flops=flops, transcendentals=2 * B,
                bytes_accessed=bytes_accessed),
        )(x_in,
          packed["w1"], packed["b1"], packed["g1"], packed["bt1"],
          packed["w2"], packed["b2"], packed["g2"], packed["bt2"],
          packed["w3"], packed["b3"])

    try:
        out = run(single_buffer_residents=True)
    except Exception:
        # pl.Buffered(1) on constant-index blocks may be rejected by some
        # jax/Mosaic versions; fall back to default (double) buffering.
        out = run(single_buffer_residents=False)

    return out[:B, :true_out]


def init_params(key, input_dim, output_dim):
    """Deterministic synthetic init (shapes match the PyTorch module)."""
    ks = jax.random.split(key, 6)

    def linear(kw, kb, in_d, out_d):
        # stored as (in, out) = transpose of PyTorch's (out, in)
        bound = 1.0 / jnp.sqrt(in_d)
        w = jax.random.uniform(kw, (in_d, out_d), jnp.float32, -bound, bound)
        b = jax.random.uniform(kb, (1, out_d), jnp.float32, -bound, bound)
        return w, b

    w1, b1 = linear(ks[0], ks[1], input_dim, input_dim)
    w2, b2 = linear(ks[2], ks[3], input_dim, input_dim)
    w3, b3 = linear(ks[4], ks[5], input_dim, output_dim)

    return {
        "w1": w1, "b1": b1,
        "g1": jnp.ones((1, input_dim), jnp.float32),
        "bt1": jnp.zeros((1, input_dim), jnp.float32),
        "w2": w2, "b2": b2,
        "g2": jnp.ones((1, input_dim), jnp.float32),
        "bt2": jnp.zeros((1, input_dim), jnp.float32),
        "w3": w3, "b3": b3,
    }


def mlp_ref(x, p):
    """Pure-JAX reference mirroring the kernel's numerics (bf16 matmul inputs,
    f32 accumulation, E[x^2]-mean^2 LayerNorm)."""
    def dot(a, w):
        return jnp.dot(a.astype(jnp.bfloat16), w.astype(jnp.bfloat16),
                       preferred_element_type=jnp.float32)

    def ln_relu(h, g, b):
        n = h.shape[-1]
        mean = jnp.sum(h, -1, keepdims=True) / n
        ex2 = jnp.sum(h * h, -1, keepdims=True) / n
        var = jnp.maximum(ex2 - mean * mean, 0.0)
        return jnp.maximum((h - mean) * lax.rsqrt(var + LN_EPS) * g + b, 0.0)

    h = ln_relu(dot(x, p["w1"]) + p["b1"], p["g1"], p["bt1"])
    h = ln_relu(dot(h, p["w2"]) + p["b2"], p["g2"], p["bt2"])
    return dot(h, p["w3"]) + p["b3"]


if __name__ == "__main__":
    key = jax.random.PRNGKey(0)
    k_x, k_p = jax.random.split(key)

    batch, input_dim, output_dim = 8, 32, 8
    x = jax.random.normal(k_x, (batch, input_dim), jnp.float32)
    params = init_params(k_p, input_dim, output_dim)
    packed = pack_params(params)   # one-time prep; reuse across forward calls

    out = mlp_forward(x, packed)
    out = jax.block_until_ready(out)

    ref = mlp_ref(x, params)
    assert out.shape == (batch, output_dim)
    max_err = float(jnp.max(jnp.abs(out - ref)))
    assert jnp.allclose(out, ref, atol=1e-4, rtol=1e-4), f"mismatch vs reference: {max_err}"

    print("KERNEL_OK")
</pallas_src>

<mosaic_0001>
module attributes {stable_mosaic.version = 11 : i64} {
  func.func @mlp_kernel(%arg0: i32, %arg1: memref<8x128xbf16, #tpu.memory_space<vmem>>, %arg2: memref<128x128xbf16, #tpu.memory_space<vmem>>, %arg3: memref<1x128xf32, #tpu.memory_space<vmem>>, %arg4: memref<1x128xf32, #tpu.memory_space<vmem>>, %arg5: memref<1x128xf32, #tpu.memory_space<vmem>>, %arg6: memref<128x128xbf16, #tpu.memory_space<vmem>>, %arg7: memref<1x128xf32, #tpu.memory_space<vmem>>, %arg8: memref<1x128xf32, #tpu.memory_space<vmem>>, %arg9: memref<1x128xf32, #tpu.memory_space<vmem>>, %arg10: memref<128x128xbf16, #tpu.memory_space<vmem>>, %arg11: memref<1x128xf32, #tpu.memory_space<vmem>>, %arg12: memref<8x128xf32, #tpu.memory_space<vmem>>) attributes {dimension_semantics = [#tpu.dimension_semantics<parallel>], iteration_bounds = array<i64: 1>, scalar_prefetch = 0 : i64, scratch_operands = 0 : i64, tpu.core_type = #tpu.core_type<tc>, window_params = [{transform_indices = @transform_0, window_bounds = array<i64: 8, 128>}, {pipeline_mode = #tpu.pipeline_mode<synchronous>, transform_indices = @transform_1, window_bounds = array<i64: 128, 128>}, {pipeline_mode = #tpu.pipeline_mode<synchronous>, transform_indices = @transform_2, window_bounds = array<i64: 1, 128>}, {pipeline_mode = #tpu.pipeline_mode<synchronous>, transform_indices = @transform_3, window_bounds = array<i64: 1, 128>}, {pipeline_mode = #tpu.pipeline_mode<synchronous>, transform_indices = @transform_4, window_bounds = array<i64: 1, 128>}, {pipeline_mode = #tpu.pipeline_mode<synchronous>, transform_indices = @transform_5, window_bounds = array<i64: 128, 128>}, {pipeline_mode = #tpu.pipeline_mode<synchronous>, transform_indices = @transform_6, window_bounds = array<i64: 1, 128>}, {pipeline_mode = #tpu.pipeline_mode<synchronous>, transform_indices = @transform_7, window_bounds = array<i64: 1, 128>}, {pipeline_mode = #tpu.pipeline_mode<synchronous>, transform_indices = @transform_8, window_bounds = array<i64: 1, 128>}, {pipeline_mode = #tpu.pipeline_mode<synchronous>, transform_indices = @transform_9, window_bounds = array<i64: 128, 128>}, {pipeline_mode = #tpu.pipeline_mode<synchronous>, transform_indices = @transform_10, window_bounds = array<i64: 1, 128>}, {transform_indices = @transform_11, window_bounds = array<i64: 8, 128>}]} {
    %c0 = arith.constant 0 : index
    %c0_0 = arith.constant 0 : index
    %0 = vector.load %arg1[%c0, %c0_0] : memref<8x128xbf16, #tpu.memory_space<vmem>>, vector<8x128xbf16>
    %c0_1 = arith.constant 0 : index
    %c0_2 = arith.constant 0 : index
    %1 = vector.load %arg2[%c0_1, %c0_2] : memref<128x128xbf16, #tpu.memory_space<vmem>>, vector<128x128xbf16>
    %cst = arith.constant dense<0.000000e+00> : vector<8x128xf32>
    %2 = tpu.matmul %0, %1, %cst {dimension_numbers = #tpu.dot_dimension_numbers<[1], [0], [0], [1], [0, 0, 1, 1], [], []>} : vector<8x128xbf16>, vector<128x128xbf16>, vector<8x128xf32> -> vector<8x128xf32>
    %c0_3 = arith.constant 0 : index
    %c0_4 = arith.constant 0 : index
    %3 = vector.load %arg3[%c0_3, %c0_4] : memref<1x128xf32, #tpu.memory_space<vmem>>, vector<1x128xf32>
    %4 = vector.broadcast %3 : vector<1x128xf32> to vector<8x128xf32>
    %5 = arith.addf %2, %4 : vector<8x128xf32>
    %c0_5 = arith.constant 0 : index
    %c0_6 = arith.constant 0 : index
    %6 = vector.load %arg4[%c0_5, %c0_6] : memref<1x128xf32, #tpu.memory_space<vmem>>, vector<1x128xf32>
    %c0_7 = arith.constant 0 : index
    %c0_8 = arith.constant 0 : index
    %7 = vector.load %arg5[%c0_7, %c0_8] : memref<1x128xf32, #tpu.memory_space<vmem>>, vector<1x128xf32>
    %cst_9 = arith.constant dense<0.000000e+00> : vector<8xf32>
    %8 = vector.multi_reduction <add>, %5, %cst_9 [1] : vector<8x128xf32> to vector<8xf32>
    %9 = vector.shape_cast %8 : vector<8xf32> to vector<8x1xf32>
    %cst_10 = arith.constant 3.125000e-02 : f32
    %10 = vector.broadcast %cst_10 : f32 to vector<8x1xf32>
    %11 = arith.mulf %9, %10 : vector<8x1xf32>
    %12 = arith.mulf %5, %5 : vector<8x128xf32>
    %cst_11 = arith.constant dense<0.000000e+00> : vector<8xf32>
    %13 = vector.multi_reduction <add>, %12, %cst_11 [1] : vector<8x128xf32> to vector<8xf32>
    %14 = vector.shape_cast %13 : vector<8xf32> to vector<8x1xf32>
    %cst_12 = arith.constant 3.125000e-02 : f32
    %15 = vector.broadcast %cst_12 : f32 to vector<8x1xf32>
    %16 = arith.mulf %14, %15 : vector<8x1xf32>
    %17 = arith.mulf %11, %11 : vector<8x1xf32>
    %18 = arith.subf %16, %17 : vector<8x1xf32>
    %cst_13 = arith.constant 0.000000e+00 : f32
    %19 = vector.broadcast %cst_13 : f32 to vector<8x1xf32>
    %20 = arith.maximumf %18, %19 : vector<8x1xf32>
    %21 = vector.broadcast %11 : vector<8x1xf32> to vector<8x128xf32>
    %22 = arith.subf %5, %21 : vector<8x128xf32>
    %cst_14 = arith.constant 9.99999974E-6 : f32
    %23 = vector.broadcast %cst_14 : f32 to vector<8x1xf32>
    %24 = arith.addf %20, %23 : vector<8x1xf32>
    %25 = math.rsqrt %24 : vector<8x1xf32>
    %26 = vector.broadcast %25 : vector<8x1xf32> to vector<8x128xf32>
    %27 = arith.mulf %22, %26 : vector<8x128xf32>
    %28 = vector.broadcast %6 : vector<1x128xf32> to vector<8x128xf32>
    %29 = arith.mulf %27, %28 : vector<8x128xf32>
    %30 = vector.broadcast %7 : vector<1x128xf32> to vector<8x128xf32>
    %31 = arith.addf %29, %30 : vector<8x128xf32>
    %cst_15 = arith.constant 0.000000e+00 : f32
    %32 = vector.broadcast %cst_15 : f32 to vector<8x128xf32>
    %33 = arith.maximumf %31, %32 : vector<8x128xf32>
    %34 = arith.truncf %33 : vector<8x128xf32> to vector<8x128xbf16>
    %c0_16 = arith.constant 0 : index
    %c0_17 = arith.constant 0 : index
    %35 = vector.load %arg6[%c0_16, %c0_17] : memref<128x128xbf16, #tpu.memory_space<vmem>>, vector<128x128xbf16>
    %cst_18 = arith.constant dense<0.000000e+00> : vector<8x128xf32>
    %36 = tpu.matmul %34, %35, %cst_18 {dimension_numbers = #tpu.dot_dimension_numbers<[1], [0], [0], [1], [0, 0, 1, 1], [], []>} : vector<8x128xbf16>, vector<128x128xbf16>, vector<8x128xf32> -> vector<8x128xf32>
    %c0_19 = arith.constant 0 : index
    %c0_20 = arith.constant 0 : index
    %37 = vector.load %arg7[%c0_19, %c0_20] : memref<1x128xf32, #tpu.memory_space<vmem>>, vector<1x128xf32>
    %38 = vector.broadcast %37 : vector<1x128xf32> to vector<8x128xf32>
    %39 = arith.addf %36, %38 : vector<8x128xf32>
    %c0_21 = arith.constant 0 : index
    %c0_22 = arith.constant 0 : index
    %40 = vector.load %arg8[%c0_21, %c0_22] : memref<1x128xf32, #tpu.memory_space<vmem>>, vector<1x128xf32>
    %c0_23 = arith.constant 0 : index
    %c0_24 = arith.constant 0 : index
    %41 = vector.load %arg9[%c0_23, %c0_24] : memref<1x128xf32, #tpu.memory_space<vmem>>, vector<1x128xf32>
    %cst_25 = arith.constant dense<0.000000e+00> : vector<8xf32>
    %42 = vector.multi_reduction <add>, %39, %cst_25 [1] : vector<8x128xf32> to vector<8xf32>
    %43 = vector.shape_cast %42 : vector<8xf32> to vector<8x1xf32>
    %cst_26 = arith.constant 3.125000e-02 : f32
    %44 = vector.broadcast %cst_26 : f32 to vector<8x1xf32>
    %45 = arith.mulf %43, %44 : vector<8x1xf32>
    %46 = arith.mulf %39, %39 : vector<8x128xf32>
    %cst_27 = arith.constant dense<0.000000e+00> : vector<8xf32>
    %47 = vector.multi_reduction <add>, %46, %cst_27 [1] : vector<8x128xf32> to vector<8xf32>
    %48 = vector.shape_cast %47 : vector<8xf32> to vector<8x1xf32>
    %cst_28 = arith.constant 3.125000e-02 : f32
    %49 = vector.broadcast %cst_28 : f32 to vector<8x1xf32>
    %50 = arith.mulf %48, %49 : vector<8x1xf32>
    %51 = arith.mulf %45, %45 : vector<8x1xf32>
    %52 = arith.subf %50, %51 : vector<8x1xf32>
    %cst_29 = arith.constant 0.000000e+00 : f32
    %53 = vector.broadcast %cst_29 : f32 to vector<8x1xf32>
    %54 = arith.maximumf %52, %53 : vector<8x1xf32>
    %55 = vector.broadcast %45 : vector<8x1xf32> to vector<8x128xf32>
    %56 = arith.subf %39, %55 : vector<8x128xf32>
    %cst_30 = arith.constant 9.99999974E-6 : f32
    %57 = vector.broadcast %cst_30 : f32 to vector<8x1xf32>
    %58 = arith.addf %54, %57 : vector<8x1xf32>
    %59 = math.rsqrt %58 : vector<8x1xf32>
    %60 = vector.broadcast %59 : vector<8x1xf32> to vector<8x128xf32>
    %61 = arith.mulf %56, %60 : vector<8x128xf32>
    %62 = vector.broadcast %40 : vector<1x128xf32> to vector<8x128xf32>
    %63 = arith.mulf %61, %62 : vector<8x128xf32>
    %64 = vector.broadcast %41 : vector<1x128xf32> to vector<8x128xf32>
    %65 = arith.addf %63, %64 : vector<8x128xf32>
    %cst_31 = arith.constant 0.000000e+00 : f32
    %66 = vector.broadcast %cst_31 : f32 to vector<8x128xf32>
    %67 = arith.maximumf %65, %66 : vector<8x128xf32>
    %68 = arith.truncf %67 : vector<8x128xf32> to vector<8x128xbf16>
    %c0_32 = arith.constant 0 : index
    %c0_33 = arith.constant 0 : index
    %69 = vector.load %arg10[%c0_32, %c0_33] : memref<128x128xbf16, #tpu.memory_space<vmem>>, vector<128x128xbf16>
    %cst_34 = arith.constant dense<0.000000e+00> : vector<8x128xf32>
    %70 = tpu.matmul %68, %69, %cst_34 {dimension_numbers = #tpu.dot_dimension_numbers<[1], [0], [0], [1], [0, 0, 1, 1], [], []>} : vector<8x128xbf16>, vector<128x128xbf16>, vector<8x128xf32> -> vector<8x128xf32>
    %c0_35 = arith.constant 0 : index
    %c0_36 = arith.constant 0 : index
    %71 = vector.load %arg11[%c0_35, %c0_36] : memref<1x128xf32, #tpu.memory_space<vmem>>, vector<1x128xf32>
    %72 = vector.broadcast %71 : vector<1x128xf32> to vector<8x128xf32>
    %73 = arith.addf %70, %72 : vector<8x128xf32>
    %c0_37 = arith.constant 0 : index
    %c0_38 = arith.constant 0 : index
    %74 = vector.load %arg12[%c0_37, %c0_38] : memref<8x128xf32, #tpu.memory_space<vmem>>, vector<8x128xf32>
    tpu.vector_store %arg12[%c0_37, %c0_38], %73 {strides = array<i32>} : memref<8x128xf32, #tpu.memory_space<vmem>>, vector<8x128xf32>,
    return
  }
  func.func @transform_0(%arg0: i32) -> (i32, i32) {
    %c0_i32 = arith.constant 0 : i32
    %c0_i32_0 = arith.constant 0 : i32
    return %arg0, %c0_i32 : i32, i32
  }
  func.func @transform_1(%arg0: i32) -> (i32, i32) {
    %c0_i32 = arith.constant 0 : i32
    %c0_i32_0 = arith.constant 0 : i32
    %c0_i32_1 = arith.constant 0 : i32
    return %c0_i32, %c0_i32_0 : i32, i32
  }
  func.func @transform_2(%arg0: i32) -> (i32, i32) {
    %c0_i32 = arith.constant 0 : i32
    %c0_i32_0 = arith.constant 0 : i32
    %c0_i32_1 = arith.constant 0 : i32
    return %c0_i32, %c0_i32_0 : i32, i32
  }
  func.func @transform_3(%arg0: i32) -> (i32, i32) {
    %c0_i32 = arith.constant 0 : i32
    %c0_i32_0 = arith.constant 0 : i32
    %c0_i32_1 = arith.constant 0 : i32
    return %c0_i32, %c0_i32_0 : i32, i32
  }
  func.func @transform_4(%arg0: i32) -> (i32, i32) {
    %c0_i32 = arith.constant 0 : i32
    %c0_i32_0 = arith.constant 0 : i32
    %c0_i32_1 = arith.constant 0 : i32
    return %c0_i32, %c0_i32_0 : i32, i32
  }
  func.func @transform_5(%arg0: i32) -> (i32, i32) {
    %c0_i32 = arith.constant 0 : i32
    %c0_i32_0 = arith.constant 0 : i32
    %c0_i32_1 = arith.constant 0 : i32
    return %c0_i32, %c0_i32_0 : i32, i32
  }
  func.func @transform_6(%arg0: i32) -> (i32, i32) {
    %c0_i32 = arith.constant 0 : i32
    %c0_i32_0 = arith.constant 0 : i32
    %c0_i32_1 = arith.constant 0 : i32
    return %c0_i32, %c0_i32_0 : i32, i32
  }
  func.func @transform_7(%arg0: i32) -> (i32, i32) {
    %c0_i32 = arith.constant 0 : i32
    %c0_i32_0 = arith.constant 0 : i32
    %c0_i32_1 = arith.constant 0 : i32
    return %c0_i32, %c0_i32_0 : i32, i32
  }
  func.func @transform_8(%arg0: i32) -> (i32, i32) {
    %c0_i32 = arith.constant 0 : i32
    %c0_i32_0 = arith.constant 0 : i32
    %c0_i32_1 = arith.constant 0 : i32
    return %c0_i32, %c0_i32_0 : i32, i32
  }
  func.func @transform_9(%arg0: i32) -> (i32, i32) {
    %c0_i32 = arith.constant 0 : i32
    %c0_i32_0 = arith.constant 0 : i32
    %c0_i32_1 = arith.constant 0 : i32
    return %c0_i32, %c0_i32_0 : i32, i32
  }
  func.func @transform_10(%arg0: i32) -> (i32, i32) {
    %c0_i32 = arith.constant 0 : i32
    %c0_i32_0 = arith.constant 0 : i32
    %c0_i32_1 = arith.constant 0 : i32
    return %c0_i32, %c0_i32_0 : i32, i32
  }
  func.func @transform_11(%arg0: i32) -> (i32, i32) {
    %c0_i32 = arith.constant 0 : i32
    %c0_i32_0 = arith.constant 0 : i32
    return %arg0, %c0_i32 : i32, i32
  }
}

module attributes {stable_mosaic.version = 11 : i64} {
  func.func @mlp_kernel(%arg0: i32, %arg1: memref<8x128xbf16, #tpu.memory_space<vmem>>, %arg2: memref<128x128xbf16, #tpu.memory_space<vmem>>, %arg3: memref<1x128xf32, #tpu.memory_space<vmem>>, %arg4: memref<1x128xf32, #tpu.memory_space<vmem>>, %arg5: memref<1x128xf32, #tpu.memory_space<vmem>>, %arg6: memref<128x128xbf16, #tpu.memory_space<vmem>>, %arg7: memref<1x128xf32, #tpu.memory_space<vmem>>, %arg8: memref<1x128xf32, #tpu.memory_space<vmem>>, %arg9: memref<1x128xf32, #tpu.memory_space<vmem>>, %arg10: memref<128x128xbf16, #tpu.memory_space<vmem>>, %arg11: memref<1x128xf32, #tpu.memory_space<vmem>>, %arg12: memref<8x128xf32, #tpu.memory_space<vmem>>) attributes {dimension_semantics = [#tpu.dimension_semantics<parallel>], iteration_bounds = array<i64: 1>, scalar_prefetch = 0 : i64, scratch_operands = 0 : i64, tpu.core_type = #tpu.core_type<tc>, window_params = [{transform_indices = @transform_0, window_bounds = array<i64: 8, 128>}, {pipeline_mode = #tpu.pipeline_mode<synchronous>, transform_indices = @transform_1, window_bounds = array<i64: 128, 128>}, {pipeline_mode = #tpu.pipeline_mode<synchronous>, transform_indices = @transform_2, window_bounds = array<i64: 1, 128>}, {pipeline_mode = #tpu.pipeline_mode<synchronous>, transform_indices = @transform_3, window_bounds = array<i64: 1, 128>}, {pipeline_mode = #tpu.pipeline_mode<synchronous>, transform_indices = @transform_4, window_bounds = array<i64: 1, 128>}, {pipeline_mode = #tpu.pipeline_mode<synchronous>, transform_indices = @transform_5, window_bounds = array<i64: 128, 128>}, {pipeline_mode = #tpu.pipeline_mode<synchronous>, transform_indices = @transform_6, window_bounds = array<i64: 1, 128>}, {pipeline_mode = #tpu.pipeline_mode<synchronous>, transform_indices = @transform_7, window_bounds = array<i64: 1, 128>}, {pipeline_mode = #tpu.pipeline_mode<synchronous>, transform_indices = @transform_8, window_bounds = array<i64: 1, 128>}, {pipeline_mode = #tpu.pipeline_mode<synchronous>, transform_indices = @transform_9, window_bounds = array<i64: 128, 128>}, {pipeline_mode = #tpu.pipeline_mode<synchronous>, transform_indices = @transform_10, window_bounds = array<i64: 1, 128>}, {transform_indices = @transform_11, window_bounds = array<i64: 8, 128>}]} {
    %c0 = arith.constant 0 : index
    %c0_0 = arith.constant 0 : index
    %0 = vector.load %arg1[%c0, %c0_0] : memref<8x128xbf16, #tpu.memory_space<vmem>>, vector<8x128xbf16>
    %c0_1 = arith.constant 0 : index
    %c0_2 = arith.constant 0 : index
    %1 = vector.load %arg2[%c0_1, %c0_2] : memref<128x128xbf16, #tpu.memory_space<vmem>>, vector<128x128xbf16>
    %cst = arith.constant dense<0.000000e+00> : vector<8x128xf32>
    %2 = tpu.matmul %0, %1, %cst {dimension_numbers = #tpu.dot_dimension_numbers<[1], [0], [0], [1], [0, 0, 1, 1], [], []>} : vector<8x128xbf16>, vector<128x128xbf16>, vector<8x128xf32> -> vector<8x128xf32>
    %c0_3 = arith.constant 0 : index
    %c0_4 = arith.constant 0 : index
    %3 = vector.load %arg3[%c0_3, %c0_4] : memref<1x128xf32, #tpu.memory_space<vmem>>, vector<1x128xf32>
    %4 = vector.broadcast %3 : vector<1x128xf32> to vector<8x128xf32>
    %5 = arith.addf %2, %4 : vector<8x128xf32>
    %c0_5 = arith.constant 0 : index
    %c0_6 = arith.constant 0 : index
    %6 = vector.load %arg4[%c0_5, %c0_6] : memref<1x128xf32, #tpu.memory_space<vmem>>, vector<1x128xf32>
    %c0_7 = arith.constant 0 : index
    %c0_8 = arith.constant 0 : index
    %7 = vector.load %arg5[%c0_7, %c0_8] : memref<1x128xf32, #tpu.memory_space<vmem>>, vector<1x128xf32>
    %cst_9 = arith.constant dense<0.000000e+00> : vector<8xf32>
    %8 = vector.multi_reduction <add>, %5, %cst_9 [1] : vector<8x128xf32> to vector<8xf32>
    %9 = vector.shape_cast %8 : vector<8xf32> to vector<8x1xf32>
    %cst_10 = arith.constant 3.125000e-02 : f32
    %10 = vector.broadcast %cst_10 : f32 to vector<8x1xf32>
    %11 = arith.mulf %9, %10 : vector<8x1xf32>
    %12 = arith.mulf %5, %5 : vector<8x128xf32>
    %cst_11 = arith.constant dense<0.000000e+00> : vector<8xf32>
    %13 = vector.multi_reduction <add>, %12, %cst_11 [1] : vector<8x128xf32> to vector<8xf32>
    %14 = vector.shape_cast %13 : vector<8xf32> to vector<8x1xf32>
    %cst_12 = arith.constant 3.125000e-02 : f32
    %15 = vector.broadcast %cst_12 : f32 to vector<8x1xf32>
    %16 = arith.mulf %14, %15 : vector<8x1xf32>
    %17 = arith.mulf %11, %11 : vector<8x1xf32>
    %18 = arith.subf %16, %17 : vector<8x1xf32>
    %cst_13 = arith.constant 0.000000e+00 : f32
    %19 = vector.broadcast %cst_13 : f32 to vector<8x1xf32>
    %20 = arith.maximumf %18, %19 : vector<8x1xf32>
    %21 = vector.broadcast %11 : vector<8x1xf32> to vector<8x128xf32>
    %22 = arith.subf %5, %21 : vector<8x128xf32>
    %cst_14 = arith.constant 9.99999974E-6 : f32
    %23 = vector.broadcast %cst_14 : f32 to vector<8x1xf32>
    %24 = arith.addf %20, %23 : vector<8x1xf32>
    %25 = math.rsqrt %24 : vector<8x1xf32>
    %26 = vector.broadcast %25 : vector<8x1xf32> to vector<8x128xf32>
    %27 = arith.mulf %22, %26 : vector<8x128xf32>
    %28 = vector.broadcast %6 : vector<1x128xf32> to vector<8x128xf32>
    %29 = arith.mulf %27, %28 : vector<8x128xf32>
    %30 = vector.broadcast %7 : vector<1x128xf32> to vector<8x128xf32>
    %31 = arith.addf %29, %30 : vector<8x128xf32>
    %cst_15 = arith.constant 0.000000e+00 : f32
    %32 = vector.broadcast %cst_15 : f32 to vector<8x128xf32>
    %33 = arith.maximumf %31, %32 : vector<8x128xf32>
    %34 = arith.truncf %33 : vector<8x128xf32> to vector<8x128xbf16>
    %c0_16 = arith.constant 0 : index
    %c0_17 = arith.constant 0 : index
    %35 = vector.load %arg6[%c0_16, %c0_17] : memref<128x128xbf16, #tpu.memory_space<vmem>>, vector<128x128xbf16>
    %cst_18 = arith.constant dense<0.000000e+00> : vector<8x128xf32>
    %36 = tpu.matmul %34, %35, %cst_18 {dimension_numbers = #tpu.dot_dimension_numbers<[1], [0], [0], [1], [0, 0, 1, 1], [], []>} : vector<8x128xbf16>, vector<128x128xbf16>, vector<8x128xf32> -> vector<8x128xf32>
    %c0_19 = arith.constant 0 : index
    %c0_20 = arith.constant 0 : index
    %37 = vector.load %arg7[%c0_19, %c0_20] : memref<1x128xf32, #tpu.memory_space<vmem>>, vector<1x128xf32>
    %38 = vector.broadcast %37 : vector<1x128xf32> to vector<8x128xf32>
    %39 = arith.addf %36, %38 : vector<8x128xf32>
    %c0_21 = arith.constant 0 : index
    %c0_22 = arith.constant 0 : index
    %40 = vector.load %arg8[%c0_21, %c0_22] : memref<1x128xf32, #tpu.memory_space<vmem>>, vector<1x128xf32>
    %c0_23 = arith.constant 0 : index
    %c0_24 = arith.constant 0 : index
    %41 = vector.load %arg9[%c0_23, %c0_24] : memref<1x128xf32, #tpu.memory_space<vmem>>, vector<1x128xf32>
    %cst_25 = arith.constant dense<0.000000e+00> : vector<8xf32>
    %42 = vector.multi_reduction <add>, %39, %cst_25 [1] : vector<8x128xf32> to vector<8xf32>
    %43 = vector.shape_cast %42 : vector<8xf32> to vector<8x1xf32>
    %cst_26 = arith.constant 3.125000e-02 : f32
    %44 = vector.broadcast %cst_26 : f32 to vector<8x1xf32>
    %45 = arith.mulf %43, %44 : vector<8x1xf32>
    %46 = arith.mulf %39, %39 : vector<8x128xf32>
    %cst_27 = arith.constant dense<0.000000e+00> : vector<8xf32>
    %47 = vector.multi_reduction <add>, %46, %cst_27 [1] : vector<8x128xf32> to vector<8xf32>
    %48 = vector.shape_cast %47 : vector<8xf32> to vector<8x1xf32>
    %cst_28 = arith.constant 3.125000e-02 : f32
    %49 = vector.broadcast %cst_28 : f32 to vector<8x1xf32>
    %50 = arith.mulf %48, %49 : vector<8x1xf32>
    %51 = arith.mulf %45, %45 : vector<8x1xf32>
    %52 = arith.subf %50, %51 : vector<8x1xf32>
    %cst_29 = arith.constant 0.000000e+00 : f32
    %53 = vector.broadcast %cst_29 : f32 to vector<8x1xf32>
    %54 = arith.maximumf %52, %53 : vector<8x1xf32>
    %55 = vector.broadcast %45 : vector<8x1xf32> to vector<8x128xf32>
    %56 = arith.subf %39, %55 : vector<8x128xf32>
    %cst_30 = arith.constant 9.99999974E-6 : f32
    %57 = vector.broadcast %cst_30 : f32 to vector<8x1xf32>
    %58 = arith.addf %54, %57 : vector<8x1xf32>
    %59 = math.rsqrt %58 : vector<8x1xf32>
    %60 = vector.broadcast %59 : vector<8x1xf32> to vector<8x128xf32>
    %61 = arith.mulf %56, %60 : vector<8x128xf32>
    %62 = vector.broadcast %40 : vector<1x128xf32> to vector<8x128xf32>
    %63 = arith.mulf %61, %62 : vector<8x128xf32>
    %64 = vector.broadcast %41 : vector<1x128xf32> to vector<8x128xf32>
    %65 = arith.addf %63, %64 : vector<8x128xf32>
    %cst_31 = arith.constant 0.000000e+00 : f32
    %66 = vector.broadcast %cst_31 : f32 to vector<8x128xf32>
    %67 = arith.maximumf %65, %66 : vector<8x128xf32>
    %68 = arith.truncf %67 : vector<8x128xf32> to vector<8x128xbf16>
    %c0_32 = arith.constant 0 : index
    %c0_33 = arith.constant 0 : index
    %69 = vector.load %arg10[%c0_32, %c0_33] : memref<128x128xbf16, #tpu.memory_space<vmem>>, vector<128x128xbf16>
    %cst_34 = arith.constant dense<0.000000e+00> : vector<8x128xf32>
    %70 = tpu.matmul %68, %69, %cst_34 {dimension_numbers = #tpu.dot_dimension_numbers<[1], [0], [0], [1], [0, 0, 1, 1], [], []>} : vector<8x128xbf16>, vector<128x128xbf16>, vector<8x128xf32> -> vector<8x128xf32>
    %c0_35 = arith.constant 0 : index
    %c0_36 = arith.constant 0 : index
    %71 = vector.load %arg11[%c0_35, %c0_36] : memref<1x128xf32, #tpu.memory_space<vmem>>, vector<1x128xf32>
    %72 = vector.broadcast %71 : vector<1x128xf32> to vector<8x128xf32>
    %73 = arith.addf %70, %72 : vector<8x128xf32>
    %c0_37 = arith.constant 0 : index
    %c0_38 = arith.constant 0 : index
    %74 = vector.load %arg12[%c0_37, %c0_38] : memref<8x128xf32, #tpu.memory_space<vmem>>, vector<8x128xf32>
    tpu.vector_store %arg12[%c0_37, %c0_38], %73 {strides = array<i32>} : memref<8x128xf32, #tpu.memory_space<vmem>>, vector<8x128xf32>,
    return
  }
  func.func @transform_0(%arg0: i32) -> (i32, i32) {
    %c0_i32 = arith.constant 0 : i32
    %c0_i32_0 = arith.constant 0 : i32
    return %arg0, %c0_i32 : i32, i32
  }
  func.func @transform_1(%arg0: i32) -> (i32, i32) {
    %c0_i32 = arith.constant 0 : i32
    %c0_i32_0 = arith.constant 0 : i32
    %c0_i32_1 = arith.constant 0 : i32
    return %c0_i32, %c0_i32_0 : i32, i32
  }
  func.func @transform_2(%arg0: i32) -> (i32, i32) {
    %c0_i32 = arith.constant 0 : i32
    %c0_i32_0 = arith.constant 0 : i32
    %c0_i32_1 = arith.constant 0 : i32
    return %c0_i32, %c0_i32_0 : i32, i32
  }
  func.func @transform_3(%arg0: i32) -> (i32, i32) {
    %c0_i32 = arith.constant 0 : i32
    %c0_i32_0 = arith.constant 0 : i32
    %c0_i32_1 = arith.constant 0 : i32
    return %c0_i32, %c0_i32_0 : i32, i32
  }
  func.func @transform_4(%arg0: i32) -> (i32, i32) {
    %c0_i32 = arith.constant 0 : i32
    %c0_i32_0 = arith.constant 0 : i32
    %c0_i32_1 = arith.constant 0 : i32
    return %c0_i32, %c0_i32_0 : i32, i32
  }
  func.func @transform_5(%arg0: i32) -> (i32, i32) {
    %c0_i32 = arith.constant 0 : i32
    %c0_i32_0 = arith.constant 0 : i32
    %c0_i32_1 = arith.constant 0 : i32
    return %c0_i32, %c0_i32_0 : i32, i32
  }
  func.func @transform_6(%arg0: i32) -> (i32, i32) {
    %c0_i32 = arith.constant 0 : i32
    %c0_i32_0 = arith.constant 0 : i32
    %c0_i32_1 = arith.constant 0 : i32
    return %c0_i32, %c0_i32_0 : i32, i32
  }
  func.func @transform_7(%arg0: i32) -> (i32, i32) {
    %c0_i32 = arith.constant 0 : i32
    %c0_i32_0 = arith.constant 0 : i32
    %c0_i32_1 = arith.constant 0 : i32
    return %c0_i32, %c0_i32_0 : i32, i32
  }
  func.func @transform_8(%arg0: i32) -> (i32, i32) {
    %c0_i32 = arith.constant 0 : i32
    %c0_i32_0 = arith.constant 0 : i32
    %c0_i32_1 = arith.constant 0 : i32
    return %c0_i32, %c0_i32_0 : i32, i32
  }
  func.func @transform_9(%arg0: i32) -> (i32, i32) {
    %c0_i32 = arith.constant 0 : i32
    %c0_i32_0 = arith.constant 0 : i32
    %c0_i32_1 = arith.constant 0 : i32
    return %c0_i32, %c0_i32_0 : i32, i32
  }
  func.func @transform_10(%arg0: i32) -> (i32, i32) {
    %c0_i32 = arith.constant 0 : i32
    %c0_i32_0 = arith.constant 0 : i32
    %c0_i32_1 = arith.constant 0 : i32
    return %c0_i32, %c0_i32_0 : i32, i32
  }
  func.func @transform_11(%arg0: i32) -> (i32, i32) {
    %c0_i32 = arith.constant 0 : i32
    %c0_i32_0 = arith.constant 0 : i32
    return %arg0, %c0_i32 : i32, i32
  }
}

</mosaic_0001>

<bundles_post_ra>
// kernel: tpu_custom_call.1
= control target key start
LH: loop header
LB: loop body
LE: loop exit
PB: predicated region body
PF: predicated region fallthrough
CT: control target
= control target key end

     0   :  { %16 = vsyncpa [#allocation3], 0  ;;  %s971_s0 = inlined_call_operand.hbm [shape: bf16[8,128], index: 0, kind: input, shape index: {}]   ;;  %s972_s1 = inlined_call_operand.hbm [shape: bf16[128,128], index: 1, kind: input, shape index: {}]   ;;  %s973_s2 = inlined_call_operand.vmem [shape: f32[1,128], index: 2, kind: input, shape index: {}]   ;;  %s974_s3 = inlined_call_operand.vmem [shape: f32[1,128], index: 3, kind: input, shape index: {}]   ;;  %s975_s4 = inlined_call_operand.vmem [shape: f32[1,128], index: 4, kind: input, shape index: {}]   ;;  %s976_s5 = inlined_call_operand.hbm [shape: bf16[128,128], index: 5, kind: input, shape index: {}]   ;;  %s977_s6 = inlined_call_operand.vmem [shape: f32[1,128], index: 6, kind: input, shape index: {}]   ;;  %s978_s7 = inlined_call_operand.vmem [shape: f32[1,128], index: 7, kind: input, shape index: {}]   ;;  %s979_s8 = inlined_call_operand.vmem [shape: f32[1,128], index: 8, kind: input, shape index: {}]   ;;  %s980_s9 = inlined_call_operand.hbm [shape: bf16[128,128], index: 9, kind: input, shape index: {}]   ;;  %s981_s10 = inlined_call_operand.vmem [shape: f32[1,128], index: 10, kind: input, shape index: {}]   ;;  %s982_s11 = inlined_call_operand.hbm [shape: f32[8,128], index: 11, kind: output, shape index: {}]  }
   0x1   :  { %17 = vsyncpa [#allocation6], 0 }
   0x2   :  { %18 = vsyncpa [#allocation9], 0 }
   0x3   :  { %19 = vsyncpa [#allocation4], 0  ;;  %s782_s17 = smov [#allocation5]   ;;  %s664_s21 = scalar_lea.hbm %s972_s1, 1024 }
   0x4   :  { %s35_s18 = sshll.u32 %s782_s17, 4  ;;  %p665_p0 = scmp.ne.s32.totalorder %s972_s1, %s664_s21  ;;  %s36_s18 = int_to_ptr.vmem [resolvable:$true] %s35_s18 }
   0x5   :  { %p668_p1 = scmp.lt.u32.totalorder %s664_s21, %s972_s1 }
   0x7   :  { %p670_p2 = pnand %p668_p1, %p665_p0 }
   0x9   :  { %673 = shalt.err (!%p670_p2)
}
   0xa   :  { %s674_s26 = scalar_lea.vmem %s36_s18, 1024  ;;  %p679_p4 = scmp.lt.s32.totalorder %s36_s18, %s36_s18 }
   0xb   :  { %p675_p3 = scmp.ne.s32.totalorder %s36_s18, %s674_s26  ;;  %p680_p5 = scmp.lt.s32.totalorder %s674_s26, %s674_s26 }
   0xd   :  { %p681_p6 = por %p680_p5, %p679_p4 }
   0xf   :  { %p682_p7 = pnand %p681_p6, %p675_p3 }
  0x11   :  { %685 = shalt.err (!%p682_p7)
}
  0x12   :  { %s783_s27 = smov 64   ;;  %s784_s28 = smov 4  }
  0x13   :  { %41 = dma.hbm_to_vmem [thread:$0]  %s972_s1, 1024, %s36_s18, [#allocation6], %s783_s27, %s783_s27, %s784_s28  }
  0x14   :  { %s785_s12 = smov [#allocation2]   ;;  %s786_s14 = smov [#allocation7]  }
  0x15   :  { %s26_s13 = sshll.u32 %s785_s12, 4  ;;  %s53_s15 = sshll.u32 %s786_s14, 4  ;;  %s27_s13 = int_to_ptr.vmem [resolvable:$true] %s26_s13  ;;  %s54_s15 = int_to_ptr.vmem [resolvable:$true] %s53_s15 }
  0x16   :  { %s686_s19 = scalar_lea.hbm %s971_s0, 64 }
  0x17   :  { %p687_p8 = scmp.ne.s32.totalorder %s971_s0, %s686_s19  ;;  %p690_p9 = scmp.lt.u32.totalorder %s686_s19, %s971_s0 }
  0x19   :  { %p692_p10 = pnand %p690_p9, %p687_p8 }
  0x1b   :  { %695 = shalt.err (!%p692_p10)
}
  0x1c   :  { %s696_s1 = scalar_lea.vmem %s27_s13, 64  ;;  %p701_p12 = scmp.lt.s32.totalorder %s27_s13, %s27_s13 }
  0x1d   :  { %p697_p11 = scmp.ne.s32.totalorder %s27_s13, %s696_s1  ;;  %p702_p13 = scmp.lt.s32.totalorder %s696_s1, %s696_s1 }
  0x1f   :  { %p703_p0 = por %p702_p13, %p701_p12 }
  0x21   :  { %p704_p1 = pnand %p703_p0, %p697_p11 }
  0x23   :  { %707 = shalt.err (!%p704_p1)
}
  0x24   :  { %29 = dma.hbm_to_vmem [thread:$0]  %s971_s0, 64, %s27_s13, [#allocation3]  }
  0x25   :  { %s708_s29 = scalar_lea.hbm %s976_s5, 1024 }
  0x26   :  { %p709_p2 = scmp.ne.s32.totalorder %s976_s5, %s708_s29  ;;  %p712_p3 = scmp.lt.u32.totalorder %s708_s29, %s976_s5 }
  0x28   :  { %p714_p4 = pnand %p712_p3, %p709_p2 }
  0x2a   :  { %717 = shalt.err (!%p714_p4)
}
  0x2b   :  { %s718_s17 = scalar_lea.vmem %s54_s15, 1024  ;;  %p723_p6 = scmp.lt.s32.totalorder %s54_s15, %s54_s15 }
  0x2c   :  { %p719_p5 = scmp.ne.s32.totalorder %s54_s15, %s718_s17  ;;  %p724_p7 = scmp.lt.s32.totalorder %s718_s17, %s718_s17 }
  0x2e   :  { %p725_p8 = por %p724_p7, %p723_p6 }
  0x30   :  { %p726_p9 = pnand %p725_p8, %p719_p5 }
  0x32   :  { %729 = shalt.err (!%p726_p9)
}
  0x33   :  { %59 = dma.hbm_to_vmem [thread:$0]  %s976_s5, 1024, %s54_s15, [#allocation6], %s783_s27, %s783_s27, %s784_s28  }
  0x34   :  { %s787_s19 = smov [#allocation8]   ;;  %s730_s23 = scalar_lea.hbm %s980_s9, 1024 }
  0x35   :  { %s71_s20 = sshll.u32 %s787_s19, 4  ;;  %p731_p10 = scmp.ne.s32.totalorder %s980_s9, %s730_s23  ;;  %s72_s20 = int_to_ptr.vmem [resolvable:$true] %s71_s20 }
  0x36   :  { %p734_p11 = scmp.lt.u32.totalorder %s730_s23, %s980_s9 }
  0x38   :  { %p736_p12 = pnand %p734_p11, %p731_p10 }
  0x3a   :  { %739 = shalt.err (!%p736_p12)
}
  0x3b   :  { %s740_s26 = scalar_lea.vmem %s72_s20, 1024  ;;  %p745_p0 = scmp.lt.s32.totalorder %s72_s20, %s72_s20 }
  0x3c   :  { %p741_p13 = scmp.ne.s32.totalorder %s72_s20, %s740_s26  ;;  %p746_p1 = scmp.lt.s32.totalorder %s740_s26, %s740_s26 }
  0x3e   :  { %p747_p2 = por %p746_p1, %p745_p0 }
  0x40   :  { %p748_p3 = pnand %p747_p2, %p741_p13 }
  0x42   :  { %751 = shalt.err (!%p748_p3)
}
  0x43   :  { %77 = dma.hbm_to_vmem [thread:$0]  %s980_s9, 1024, %s72_s20, [#allocation9], %s783_s27, %s783_s27, %s784_s28  }
  0x44   :  { %774 = dma.done.wait [#allocation3], 64  }
  0x45   :  { %775 = vsyncadd [#allocation3], 4294967232 }
  0x46   :  { %776 = dma.done.wait [#allocation6], 2048  }
  0x47   :  { %777 = vsyncadd [#allocation6], 4294965248 }
  0x48   :  { %778 = dma.done.wait [#allocation9], 1024  }
  0x49   :  { %779 = vsyncadd [#allocation9], 4294966272  ;;  %v788_v0 = vmov 0.0   ;;  %vm789_vm0 = vmmov 0   ;;  %v636_v1 = vld [vmem:[#allocation5] sm:$0xff]   ;;  %v637_v2 = vld [vmem:[#allocation5 + $0x8] sm:$0xff]  }
  0x4a   :  { %567 = vmatprep.subr.bf16.mxu0 %v788_v0  ;;  %583 = vmatprep.mubr.msk.bf16.mxu0 %vm789_vm0, %v788_v0  ;;  %v638_v3 = vld [vmem:[#allocation5 + $0x10] sm:$0xff]   ;;  %v639_v4 = vld [vmem:[#allocation5 + $0x18] sm:$0xff]   ;;  %v640_v5 = vld [vmem:[#allocation5 + $0x20] sm:$0xff]   ;;  %s790_s13 = smov [#allocation10]  }
  0x4b   :  { %587 = vmatprep.subr.bf16.mxu1 %v788_v0  ;;  %603 = vmatprep.mubr.msk.bf16.mxu1 %vm789_vm0, %v788_v0  ;;  %v641_v6 = vld [vmem:[#allocation5 + $0x28] sm:$0xff]   ;;  %v642_v7 = vld [vmem:[#allocation5 + $0x30] sm:$0xff]   ;;  %v643_v8 = vld [vmem:[#allocation5 + $0x38] sm:$0xff]   ;;  %s498_s19 = sshll.u32 %s790_s13, 4  ;;  %s499_s19 = int_to_ptr.vmem [resolvable:$true] %s498_s19 }
  0x4c   :  { %568 = vmatpush3.bf16.msra.mxu0 %v636_v1  ;;  %v93_v9 = vld [vmem:[#allocation2] sm:$0xf]  ;;  %v644_v17 = vld [vmem:[#allocation7] sm:$0xff]   ;;  %v645_v18 = vld [vmem:[#allocation7 + $0x8] sm:$0xff]   ;;  %p757_p5 = scmp.lt.s32.totalorder %s499_s19, %s499_s19 }
  0x4d   :  { %569 = vmatprep.subr.bf16.mxu0 %v788_v0  ;;  %v509_v10 = vld [vmem:[%s973_s2] ss:$0 sm:$0xff]  ;;  %588 = vmatpush3.bf16.msra.mxu1 %v644_v17  ;;  %v646_v19 = vld [vmem:[#allocation7 + $0x10] sm:$0xff]   ;;  %v648_v21 = vld [vmem:[#allocation7 + $0x20] sm:$0xff]  }
  0x4e   :  { %589 = vmatprep.subr.bf16.mxu1 %v788_v0  ;;  %v647_v20 = vld [vmem:[#allocation7 + $0x18] sm:$0xff]   ;;  %v649_v22 = vld [vmem:[#allocation7 + $0x28] sm:$0xff]   ;;  %v650_v23 = vld [vmem:[#allocation7 + $0x30] sm:$0xff]  }
  0x4f   :  { %v651_v24 = vld [vmem:[#allocation7 + $0x38] sm:$0xff]   ;;  %v652_v49 = vld [vmem:[#allocation8] sm:$0xff]   ;;  %v653_v50 = vld [vmem:[#allocation8 + $0x8] sm:$0xff]  }
  0x50   :  { %570 = vmatpush3.bf16.msra.mxu0 %v637_v2  ;;  %v518_v35 = vld [vmem:[%s974_s3] ss:$0 sm:$0xff]  ;;  %v654_v51 = vld [vmem:[#allocation8 + $0x10] sm:$0xff]   ;;  %v656_v53 = vld [vmem:[#allocation8 + $0x20] sm:$0xff]  }
  0x51   :  { %571 = vmatprep.subr.bf16.mxu0 %v788_v0  ;;  %590 = vmatpush3.bf16.msra.mxu1 %v645_v18  ;;  %v519_v37 = vld [vmem:[%s975_s4] ss:$0 sm:$0xff]  ;;  %v657_v54 = vld [vmem:[#allocation8 + $0x28] sm:$0xff]   ;;  %v658_v55 = vld [vmem:[#allocation8 + $0x30] sm:$0xff]  }
  0x52   :  { %591 = vmatprep.subr.bf16.mxu1 %v788_v0  ;;  %v520_v42 = vld [vmem:[%s977_s6] ss:$0 sm:$0xff] }
  0x53   :  { %v655_v52 = vld [vmem:[#allocation8 + $0x18] sm:$0xff]  }
  0x54   :  { %572 = vmatpush3.bf16.msra.mxu0 %v638_v3  ;;  %v659_v56 = vld [vmem:[#allocation8 + $0x38] sm:$0xff]  }
  0x55   :  { %573 = vmatprep.subr.bf16.mxu0 %v788_v0  ;;  %592 = vmatpush3.bf16.msra.mxu1 %v646_v19 }
  0x56   :  { %593 = vmatprep.subr.bf16.mxu1 %v788_v0 }
  0x58   :  { %574 = vmatpush3.bf16.msra.mxu0 %v639_v4  ;;  %v529_v4 = vld [vmem:[%s978_s7] ss:$0 sm:$0xff]  ;;  %s752_s7 = scalar_lea.vmem %s499_s19, 128 }
  0x59   :  { %575 = vmatprep.subr.bf16.mxu0 %v788_v0  ;;  %594 = vmatpush3.bf16.msra.mxu1 %v647_v20  ;;  %p753_p4 = scmp.ne.s32.totalorder %s499_s19, %s752_s7  ;;  %p758_p6 = scmp.lt.s32.totalorder %s752_s7, %s752_s7 }
  0x5a   :  { %595 = vmatprep.subr.bf16.mxu1 %v788_v0 }
  0x5b   :  { %p759_p7 = por %p758_p6, %p757_p5 }
  0x5c   :  { %576 = vmatpush3.bf16.msra.mxu0 %v640_v5 }
  0x5d   :  { %577 = vmatprep.subr.bf16.mxu0 %v788_v0  ;;  %596 = vmatpush3.bf16.msra.mxu1 %v648_v21  ;;  %p760_p8 = pnand %p759_p7, %p753_p4 }
  0x5e   :  { %597 = vmatprep.subr.bf16.mxu1 %v788_v0 }
  0x60   :  { %578 = vmatpush3.bf16.msra.mxu0 %v641_v6 }
  0x61   :  { %579 = vmatprep.subr.bf16.mxu0 %v788_v0  ;;  %598 = vmatpush3.bf16.msra.mxu1 %v649_v22 }
  0x62   :  { %599 = vmatprep.subr.bf16.mxu1 %v788_v0 }
  0x64   :  { %580 = vmatpush3.bf16.msra.mxu0 %v642_v7 }
  0x65   :  { %581 = vmatprep.subr.bf16.mxu0 %v788_v0  ;;  %600 = vmatpush3.bf16.msra.mxu1 %v650_v23 }
  0x66   :  { %601 = vmatprep.subr.bf16.mxu1 %v788_v0 }
  0x68   :  { %582 = vmatpush3.bf16.msra.mxu0 %v643_v8 }
  0x69   :  { %607 = vmatprep.subr.bf16.mxu0 %v788_v0  ;;  %602 = vmatpush3.bf16.msra.mxu1 %v651_v24 }
  0x6b   :  { %584 = vmatmul.mubr.bf16.vlgmr.msra.gmra.mrb[0].mxu0 %v93_v9 }
  0x6c   :  { %623 = vmatprep.mubr.msk.bf16.mxu0 %vm789_vm0, %v788_v0  ;;  %608 = vmatpush3.bf16.msra.mxu0 %v652_v49 }
  0x6d   :  { %609 = vmatprep.subr.bf16.mxu0 %v788_v0 }
  0x70   :  { %610 = vmatpush3.bf16.msra.mxu0 %v653_v50 }
  0x71   :  { %611 = vmatprep.subr.bf16.mxu0 %v788_v0 }
  0x74   :  { %612 = vmatpush3.bf16.msra.mxu0 %v654_v51 }
  0x75   :  { %613 = vmatprep.subr.bf16.mxu0 %v788_v0 }
  0x78   :  { %614 = vmatpush3.bf16.msra.mxu0 %v655_v52 }
  0x79   :  { %615 = vmatprep.subr.bf16.mxu0 %v788_v0 }
  0x7c   :  { %616 = vmatpush3.bf16.msra.mxu0 %v656_v53 }
  0x7d   :  { %617 = vmatprep.subr.bf16.mxu0 %v788_v0 }
  0x80   :  { %618 = vmatpush3.bf16.msra.mxu0 %v657_v54 }
  0x81   :  { %619 = vmatprep.subr.bf16.mxu0 %v788_v0 }
  0x84   :  { %620 = vmatpush3.bf16.msra.mxu0 %v658_v55 }
  0x85   :  { %621 = vmatprep.subr.bf16.mxu0 %v788_v0  ;;  %v530_v0 = vld [vmem:[%s979_s8] ss:$0 sm:$0xff] }
  0x88   :  { %622 = vmatpush3.bf16.msra.mxu0 %v659_v56 }
 0x13e   :  { %v199_v11 = vpop.f32.mrb[0].mxu0 }
 0x13f   :  { %v200_v12 = vadd.f32 %v509_v10, %v199_v11  ;;  %v585_v13 = vpop.f32.mrb[1].mxu0  ;;  %v531_v10 = vld [vmem:[%s981_s10] ss:$0 sm:$0xff] }
 0x140   :  { %v202_v14 = vpop.f32.mrb[2].mxu0 }
 0x141   :  { %207 = vadd.xlane.f32.xlu0 %v200_v12  ;;  %v586_v15 = vpop.f32.mrb[3].mxu0  ;;  %v210_v16 = vmul.f32 %v200_v12, %v200_v12 }
 0x145   :  { %211 = vadd.xlane.f32.xlu0 %v210_v16 }
 0x1ce   :  { %v208_v25 = vpop.xlane.xlu0 %207 }
 0x1cf   :  { %v209_v26 = vmul.f32 0.03125, %v208_v25 }
 0x1d1   :  { %v214_v28 = vmul.f32 %v209_v26, %v209_v26  ;;  %v217_v33 = vsub.f32 %v200_v12, %v209_v26 }
 0x1d2   :  { %v212_v27 = vpop.xlane.xlu0 %211 }
 0x1d3   :  { %v213_v29 = vmul.f32 0.03125, %v212_v27 }
 0x1d5   :  { %v215_v30 = vsub.f32 %v213_v29, %v214_v28 }
 0x1d7   :  { %v216_v31 = vmax.f32 %v215_v30, 0.0 }
 0x1d9   :  { %v218_v32 = vadd.f32 1e-05, %v216_v31 }
 0x1db   :  { %660 = vrsqrt.f32 %v218_v32 }
 0x1e5   :  { %v661_v34 = vpop.eup %660 }
 0x1e6   :  { %v220_v36 = vmul.f32 %v661_v34, %v217_v33 }
 0x1e8   :  { %v227_v38 = vmul.f32 %v518_v35, %v220_v36 }
 0x1ea   :  { %v234_v39 = vadd.f32 %v519_v37, %v227_v38 }
 0x1ec   :  { %v235_v40 = vmax.f32 %v234_v39, 0.0 }
 0x1ee   :  { %v236_v41 = vpack.c.bf16 %v235_v40, %v235_v40 }
 0x1f0   :  { %604 = vmatmul.mubr.bf16.vlgmr.msra.gmra.mrb[0].mxu1 %v236_v41 }
 0x2c3   :  { %v342_v43 = vpop.f32.mrb[0].mxu1 }
 0x2c4   :  { %v343_v44 = vadd.f32 %v520_v42, %v342_v43  ;;  %v605_v45 = vpop.f32.mrb[1].mxu1 }
 0x2c5   :  { %v345_v46 = vpop.f32.mrb[2].mxu1 }
 0x2c6   :  { %350 = vadd.xlane.f32.xlu1 %v343_v44  ;;  %v606_v47 = vpop.f32.mrb[3].mxu1  ;;  %v353_v48 = vmul.f32 %v343_v44, %v343_v44 }
 0x2ca   :  { %354 = vadd.xlane.f32.xlu1 %v353_v48 }
 0x353   :  { %v351_v57 = vpop.xlane.xlu1 %350 }
 0x354   :  { %v352_v58 = vmul.f32 0.03125, %v351_v57 }
 0x356   :  { %v357_v60 = vmul.f32 %v352_v58, %v352_v58  ;;  %v360_v2 = vsub.f32 %v343_v44, %v352_v58 }
 0x357   :  { %v355_v59 = vpop.xlane.xlu1 %354 }
 0x358   :  { %v356_v61 = vmul.f32 0.03125, %v355_v59 }
 0x35a   :  { %v358_v62 = vsub.f32 %v356_v61, %v357_v60 }
 0x35c   :  { %v359_v63 = vmax.f32 %v358_v62, 0.0 }
 0x35e   :  { %v361_v1 = vadd.f32 1e-05, %v359_v63 }
 0x360   :  { %662 = vrsqrt.f32 %v361_v1 }
 0x36a   :  { %v663_v3 = vpop.eup %662 }
 0x36b   :  { %v363_v5 = vmul.f32 %v663_v3, %v360_v2 }
 0x36d   :  { %v370_v6 = vmul.f32 %v529_v4, %v363_v5 }
 0x36f   :  { %v377_v7 = vadd.f32 %v530_v0, %v370_v6 }
 0x371   :  { %v378_v8 = vmax.f32 %v377_v7, 0.0 }
 0x373   :  { %v379_v9 = vpack.c.bf16 %v378_v8, %v378_v8 }
 0x375   :  { %624 = vmatmul.mubr.bf16.vlgmr.msra.gmra.mrb[4].mxu0 %v379_v9 }
 0x448   :  { %v485_v11 = vpop.f32.mrb[4].mxu0 }
 0x449   :  { %v486_v12 = vadd.f32 %v531_v10, %v485_v11  ;;  %v625_v13 = vpop.f32.mrb[5].mxu0 }
 0x44a   :  { %v488_v14 = vpop.f32.mrb[6].mxu0 }
 0x44b   :  { %491 = vst [vmem:[#allocation10] sm:$0xff] %v486_v12  ;;  %v626_v15 = vpop.f32.mrb[7].mxu0 }
 0x44c   :  { %763 = shalt.err (!%p760_p8)
}
 0x44d   :  { %s764_s10 = scalar_lea.hbm %s982_s11, 128 }
 0x44e   :  { %p765_p9 = scmp.ne.s32.totalorder %s982_s11, %s764_s10  ;;  %p768_p10 = scmp.lt.u32.totalorder %s764_s10, %s982_s11 }
 0x450   :  { %p770_p11 = pnand %p768_p10, %p765_p9 }
 0x452   :  { %773 = shalt.err (!%p770_p11)
}
 0x453   :  { %501 = dma.vmem_to_hbm [thread:$0]  %s499_s19, 128, %s982_s11, [#allocation4]  }
 0x454   :  { %780 = dma.done.wait [#allocation4], 128  }
 0x455   :  { %781 = vsyncadd [#allocation4], 4294967168 }
 0x456   :  { %505 = vsyncpa [#allocation3], 1 }
 0x457   :  { %506 = vsyncpa [#allocation6], 1 }
 0x458   :  { %507 = vsyncpa [#allocation9], 1 }
 0x459   :  { %508 = vsyncpa [#allocation4], 1 }

// kernel: tpu_custom_call.1
= control target key start
LH: loop header
LB: loop body
LE: loop exit
PB: predicated region body
PF: predicated region fallthrough
CT: control target
= control target key end

     0   :  { %16 = vsyncpa [#allocation3], 0  ;;  %s971_s0 = inlined_call_operand.hbm [shape: bf16[8,128], index: 0, kind: input, shape index: {}]   ;;  %s972_s1 = inlined_call_operand.hbm [shape: bf16[128,128], index: 1, kind: input, shape index: {}]   ;;  %s973_s2 = inlined_call_operand.vmem [shape: f32[1,128], index: 2, kind: input, shape index: {}]   ;;  %s974_s3 = inlined_call_operand.vmem [shape: f32[1,128], index: 3, kind: input, shape index: {}]   ;;  %s975_s4 = inlined_call_operand.vmem [shape: f32[1,128], index: 4, kind: input, shape index: {}]   ;;  %s976_s5 = inlined_call_operand.hbm [shape: bf16[128,128], index: 5, kind: input, shape index: {}]   ;;  %s977_s6 = inlined_call_operand.vmem [shape: f32[1,128], index: 6, kind: input, shape index: {}]   ;;  %s978_s7 = inlined_call_operand.vmem [shape: f32[1,128], index: 7, kind: input, shape index: {}]   ;;  %s979_s8 = inlined_call_operand.vmem [shape: f32[1,128], index: 8, kind: input, shape index: {}]   ;;  %s980_s9 = inlined_call_operand.hbm [shape: bf16[128,128], index: 9, kind: input, shape index: {}]   ;;  %s981_s10 = inlined_call_operand.vmem [shape: f32[1,128], index: 10, kind: input, shape index: {}]   ;;  %s982_s11 = inlined_call_operand.hbm [shape: f32[8,128], index: 11, kind: output, shape index: {}]  }
   0x1   :  { %17 = vsyncpa [#allocation6], 0 }
   0x2   :  { %18 = vsyncpa [#allocation9], 0 }
   0x3   :  { %19 = vsyncpa [#allocation4], 0  ;;  %s782_s17 = smov [#allocation5]   ;;  %s664_s21 = scalar_lea.hbm %s972_s1, 1024 }
   0x4   :  { %s35_s18 = sshll.u32 %s782_s17, 4  ;;  %p665_p0 = scmp.ne.s32.totalorder %s972_s1, %s664_s21  ;;  %s36_s18 = int_to_ptr.vmem [resolvable:$true] %s35_s18 }
   0x5   :  { %p668_p1 = scmp.lt.u32.totalorder %s664_s21, %s972_s1 }
   0x7   :  { %p670_p2 = pnand %p668_p1, %p665_p0 }
   0x9   :  { %673 = shalt.err (!%p670_p2)
}
   0xa   :  { %s674_s26 = scalar_lea.vmem %s36_s18, 1024  ;;  %p679_p4 = scmp.lt.s32.totalorder %s36_s18, %s36_s18 }
   0xb   :  { %p675_p3 = scmp.ne.s32.totalorder %s36_s18, %s674_s26  ;;  %p680_p5 = scmp.lt.s32.totalorder %s674_s26, %s674_s26 }
   0xd   :  { %p681_p6 = por %p680_p5, %p679_p4 }
   0xf   :  { %p682_p7 = pnand %p681_p6, %p675_p3 }
  0x11   :  { %685 = shalt.err (!%p682_p7)
}
  0x12   :  { %s783_s27 = smov 64   ;;  %s784_s28 = smov 4  }
  0x13   :  { %41 = dma.hbm_to_vmem [thread:$0]  %s972_s1, 1024, %s36_s18, [#allocation6], %s783_s27, %s783_s27, %s784_s28  }
  0x14   :  { %s785_s12 = smov [#allocation2]   ;;  %s786_s14 = smov [#allocation7]  }
  0x15   :  { %s26_s13 = sshll.u32 %s785_s12, 4  ;;  %s53_s15 = sshll.u32 %s786_s14, 4  ;;  %s27_s13 = int_to_ptr.vmem [resolvable:$true] %s26_s13  ;;  %s54_s15 = int_to_ptr.vmem [resolvable:$true] %s53_s15 }
  0x16   :  { %s686_s19 = scalar_lea.hbm %s971_s0, 64 }
  0x17   :  { %p687_p8 = scmp.ne.s32.totalorder %s971_s0, %s686_s19  ;;  %p690_p9 = scmp.lt.u32.totalorder %s686_s19, %s971_s0 }
  0x19   :  { %p692_p10 = pnand %p690_p9, %p687_p8 }
  0x1b   :  { %695 = shalt.err (!%p692_p10)
}
  0x1c   :  { %s696_s1 = scalar_lea.vmem %s27_s13, 64  ;;  %p701_p12 = scmp.lt.s32.totalorder %s27_s13, %s27_s13 }
  0x1d   :  { %p697_p11 = scmp.ne.s32.totalorder %s27_s13, %s696_s1  ;;  %p702_p13 = scmp.lt.s32.totalorder %s696_s1, %s696_s1 }
  0x1f   :  { %p703_p0 = por %p702_p13, %p701_p12 }
  0x21   :  { %p704_p1 = pnand %p703_p0, %p697_p11 }
  0x23   :  { %707 = shalt.err (!%p704_p1)
}
  0x24   :  { %29 = dma.hbm_to_vmem [thread:$0]  %s971_s0, 64, %s27_s13, [#allocation3]  }
  0x25   :  { %s708_s29 = scalar_lea.hbm %s976_s5, 1024 }
  0x26   :  { %p709_p2 = scmp.ne.s32.totalorder %s976_s5, %s708_s29  ;;  %p712_p3 = scmp.lt.u32.totalorder %s708_s29, %s976_s5 }
  0x28   :  { %p714_p4 = pnand %p712_p3, %p709_p2 }
  0x2a   :  { %717 = shalt.err (!%p714_p4)
}
  0x2b   :  { %s718_s17 = scalar_lea.vmem %s54_s15, 1024  ;;  %p723_p6 = scmp.lt.s32.totalorder %s54_s15, %s54_s15 }
  0x2c   :  { %p719_p5 = scmp.ne.s32.totalorder %s54_s15, %s718_s17  ;;  %p724_p7 = scmp.lt.s32.totalorder %s718_s17, %s718_s17 }
  0x2e   :  { %p725_p8 = por %p724_p7, %p723_p6 }
  0x30   :  { %p726_p9 = pnand %p725_p8, %p719_p5 }
  0x32   :  { %729 = shalt.err (!%p726_p9)
}
  0x33   :  { %59 = dma.hbm_to_vmem [thread:$0]  %s976_s5, 1024, %s54_s15, [#allocation6], %s783_s27, %s783_s27, %s784_s28  }
  0x34   :  { %s787_s19 = smov [#allocation8]   ;;  %s730_s23 = scalar_lea.hbm %s980_s9, 1024 }
  0x35   :  { %s71_s20 = sshll.u32 %s787_s19, 4  ;;  %p731_p10 = scmp.ne.s32.totalorder %s980_s9, %s730_s23  ;;  %s72_s20 = int_to_ptr.vmem [resolvable:$true] %s71_s20 }
  0x36   :  { %p734_p11 = scmp.lt.u32.totalorder %s730_s23, %s980_s9 }
  0x38   :  { %p736_p12 = pnand %p734_p11, %p731_p10 }
  0x3a   :  { %739 = shalt.err (!%p736_p12)
}
  0x3b   :  { %s740_s26 = scalar_lea.vmem %s72_s20, 1024  ;;  %p745_p0 = scmp.lt.s32.totalorder %s72_s20, %s72_s20 }
  0x3c   :  { %p741_p13 = scmp.ne.s32.totalorder %s72_s20, %s740_s26  ;;  %p746_p1 = scmp.lt.s32.totalorder %s740_s26, %s740_s26 }
  0x3e   :  { %p747_p2 = por %p746_p1, %p745_p0 }
  0x40   :  { %p748_p3 = pnand %p747_p2, %p741_p13 }
  0x42   :  { %751 = shalt.err (!%p748_p3)
}
  0x43   :  { %77 = dma.hbm_to_vmem [thread:$0]  %s980_s9, 1024, %s72_s20, [#allocation9], %s783_s27, %s783_s27, %s784_s28  }
  0x44   :  { %774 = dma.done.wait [#allocation3], 64  }
  0x45   :  { %775 = vsyncadd [#allocation3], 4294967232 }
  0x46   :  { %776 = dma.done.wait [#allocation6], 2048  }
  0x47   :  { %777 = vsyncadd [#allocation6], 4294965248 }
  0x48   :  { %778 = dma.done.wait [#allocation9], 1024  }
  0x49   :  { %779 = vsyncadd [#allocation9], 4294966272  ;;  %v788_v0 = vmov 0.0   ;;  %vm789_vm0 = vmmov 0   ;;  %v636_v1 = vld [vmem:[#allocation5] sm:$0xff]   ;;  %v637_v2 = vld [vmem:[#allocation5 + $0x8] sm:$0xff]  }
  0x4a   :  { %567 = vmatprep.subr.bf16.mxu0 %v788_v0  ;;  %583 = vmatprep.mubr.msk.bf16.mxu0 %vm789_vm0, %v788_v0  ;;  %v638_v3 = vld [vmem:[#allocation5 + $0x10] sm:$0xff]   ;;  %v639_v4 = vld [vmem:[#allocation5 + $0x18] sm:$0xff]   ;;  %v640_v5 = vld [vmem:[#allocation5 + $0x20] sm:$0xff]   ;;  %s790_s13 = smov [#allocation10]  }
  0x4b   :  { %587 = vmatprep.subr.bf16.mxu1 %v788_v0  ;;  %603 = vmatprep.mubr.msk.bf16.mxu1 %vm789_vm0, %v788_v0  ;;  %v641_v6 = vld [vmem:[#allocation5 + $0x28] sm:$0xff]   ;;  %v642_v7 = vld [vmem:[#allocation5 + $0x30] sm:$0xff]   ;;  %v643_v8 = vld [vmem:[#allocation5 + $0x38] sm:$0xff]   ;;  %s498_s19 = sshll.u32 %s790_s13, 4  ;;  %s499_s19 = int_to_ptr.vmem [resolvable:$true] %s498_s19 }
  0x4c   :  { %568 = vmatpush3.bf16.msra.mxu0 %v636_v1  ;;  %v93_v9 = vld [vmem:[#allocation2] sm:$0xf]  ;;  %v644_v17 = vld [vmem:[#allocation7] sm:$0xff]   ;;  %v645_v18 = vld [vmem:[#allocation7 + $0x8] sm:$0xff]   ;;  %p757_p5 = scmp.lt.s32.totalorder %s499_s19, %s499_s19 }
  0x4d   :  { %569 = vmatprep.subr.bf16.mxu0 %v788_v0  ;;  %v509_v10 = vld [vmem:[%s973_s2] ss:$0 sm:$0xff]  ;;  %588 = vmatpush3.bf16.msra.mxu1 %v644_v17  ;;  %v646_v19 = vld [vmem:[#allocation7 + $0x10] sm:$0xff]   ;;  %v648_v21 = vld [vmem:[#allocation7 + $0x20] sm:$0xff]  }
  0x4e   :  { %589 = vmatprep.subr.bf16.mxu1 %v788_v0  ;;  %v647_v20 = vld [vmem:[#allocation7 + $0x18] sm:$0xff]   ;;  %v649_v22 = vld [vmem:[#allocation7 + $0x28] sm:$0xff]   ;;  %v650_v23 = vld [vmem:[#allocation7 + $0x30] sm:$0xff]  }
  0x4f   :  { %v651_v24 = vld [vmem:[#allocation7 + $0x38] sm:$0xff]   ;;  %v652_v49 = vld [vmem:[#allocation8] sm:$0xff]   ;;  %v653_v50 = vld [vmem:[#allocation8 + $0x8] sm:$0xff]  }
  0x50   :  { %570 = vmatpush3.bf16.msra.mxu0 %v637_v2  ;;  %v518_v35 = vld [vmem:[%s974_s3] ss:$0 sm:$0xff]  ;;  %v654_v51 = vld [vmem:[#allocation8 + $0x10] sm:$0xff]   ;;  %v656_v53 = vld [vmem:[#allocation8 + $0x20] sm:$0xff]  }
  0x51   :  { %571 = vmatprep.subr.bf16.mxu0 %v788_v0  ;;  %590 = vmatpush3.bf16.msra.mxu1 %v645_v18  ;;  %v519_v37 = vld [vmem:[%s975_s4] ss:$0 sm:$0xff]  ;;  %v657_v54 = vld [vmem:[#allocation8 + $0x28] sm:$0xff]   ;;  %v658_v55 = vld [vmem:[#allocation8 + $0x30] sm:$0xff]  }
  0x52   :  { %591 = vmatprep.subr.bf16.mxu1 %v788_v0  ;;  %v520_v42 = vld [vmem:[%s977_s6] ss:$0 sm:$0xff] }
  0x53   :  { %v655_v52 = vld [vmem:[#allocation8 + $0x18] sm:$0xff]  }
  0x54   :  { %572 = vmatpush3.bf16.msra.mxu0 %v638_v3  ;;  %v659_v56 = vld [vmem:[#allocation8 + $0x38] sm:$0xff]  }
  0x55   :  { %573 = vmatprep.subr.bf16.mxu0 %v788_v0  ;;  %592 = vmatpush3.bf16.msra.mxu1 %v646_v19 }
  0x56   :  { %593 = vmatprep.subr.bf16.mxu1 %v788_v0 }
  0x58   :  { %574 = vmatpush3.bf16.msra.mxu0 %v639_v4  ;;  %v529_v4 = vld [vmem:[%s978_s7] ss:$0 sm:$0xff]  ;;  %s752_s7 = scalar_lea.vmem %s499_s19, 128 }
  0x59   :  { %575 = vmatprep.subr.bf16.mxu0 %v788_v0  ;;  %594 = vmatpush3.bf16.msra.mxu1 %v647_v20  ;;  %p753_p4 = scmp.ne.s32.totalorder %s499_s19, %s752_s7  ;;  %p758_p6 = scmp.lt.s32.totalorder %s752_s7, %s752_s7 }
  0x5a   :  { %595 = vmatprep.subr.bf16.mxu1 %v788_v0 }
  0x5b   :  { %p759_p7 = por %p758_p6, %p757_p5 }
  0x5c   :  { %576 = vmatpush3.bf16.msra.mxu0 %v640_v5 }
  0x5d   :  { %577 = vmatprep.subr.bf16.mxu0 %v788_v0  ;;  %596 = vmatpush3.bf16.msra.mxu1 %v648_v21  ;;  %p760_p8 = pnand %p759_p7, %p753_p4 }
  0x5e   :  { %597 = vmatprep.subr.bf16.mxu1 %v788_v0 }
  0x60   :  { %578 = vmatpush3.bf16.msra.mxu0 %v641_v6 }
  0x61   :  { %579 = vmatprep.subr.bf16.mxu0 %v788_v0  ;;  %598 = vmatpush3.bf16.msra.mxu1 %v649_v22 }
  0x62   :  { %599 = vmatprep.subr.bf16.mxu1 %v788_v0 }
  0x64   :  { %580 = vmatpush3.bf16.msra.mxu0 %v642_v7 }
  0x65   :  { %581 = vmatprep.subr.bf16.mxu0 %v788_v0  ;;  %600 = vmatpush3.bf16.msra.mxu1 %v650_v23 }
  0x66   :  { %601 = vmatprep.subr.bf16.mxu1 %v788_v0 }
  0x68   :  { %582 = vmatpush3.bf16.msra.mxu0 %v643_v8 }
  0x69   :  { %607 = vmatprep.subr.bf16.mxu0 %v788_v0  ;;  %602 = vmatpush3.bf16.msra.mxu1 %v651_v24 }
  0x6b   :  { %584 = vmatmul.mubr.bf16.vlgmr.msra.gmra.mrb[0].mxu0 %v93_v9 }
  0x6c   :  { %623 = vmatprep.mubr.msk.bf16.mxu0 %vm789_vm0, %v788_v0  ;;  %608 = vmatpush3.bf16.msra.mxu0 %v652_v49 }
  0x6d   :  { %609 = vmatprep.subr.bf16.mxu0 %v788_v0 }
  0x70   :  { %610 = vmatpush3.bf16.msra.mxu0 %v653_v50 }
  0x71   :  { %611 = vmatprep.subr.bf16.mxu0 %v788_v0 }
  0x74   :  { %612 = vmatpush3.bf16.msra.mxu0 %v654_v51 }
  0x75   :  { %613 = vmatprep.subr.bf16.mxu0 %v788_v0 }
  0x78   :  { %614 = vmatpush3.bf16.msra.mxu0 %v655_v52 }
  0x79   :  { %615 = vmatprep.subr.bf16.mxu0 %v788_v0 }
  0x7c   :  { %616 = vmatpush3.bf16.msra.mxu0 %v656_v53 }
  0x7d   :  { %617 = vmatprep.subr.bf16.mxu0 %v788_v0 }
  0x80   :  { %618 = vmatpush3.bf16.msra.mxu0 %v657_v54 }
  0x81   :  { %619 = vmatprep.subr.bf16.mxu0 %v788_v0 }
  0x84   :  { %620 = vmatpush3.bf16.msra.mxu0 %v658_v55 }
  0x85   :  { %621 = vmatprep.subr.bf16.mxu0 %v788_v0  ;;  %v530_v0 = vld [vmem:[%s979_s8] ss:$0 sm:$0xff] }
  0x88   :  { %622 = vmatpush3.bf16.msra.mxu0 %v659_v56 }
 0x13e   :  { %v199_v11 = vpop.f32.mrb[0].mxu0 }
 0x13f   :  { %v200_v12 = vadd.f32 %v509_v10, %v199_v11  ;;  %v585_v13 = vpop.f32.mrb[1].mxu0  ;;  %v531_v10 = vld [vmem:[%s981_s10] ss:$0 sm:$0xff] }
 0x140   :  { %v202_v14 = vpop.f32.mrb[2].mxu0 }
 0x141   :  { %207 = vadd.xlane.f32.xlu0 %v200_v12  ;;  %v586_v15 = vpop.f32.mrb[3].mxu0  ;;  %v210_v16 = vmul.f32 %v200_v12, %v200_v12 }
 0x145   :  { %211 = vadd.xlane.f32.xlu0 %v210_v16 }
 0x1ce   :  { %v208_v25 = vpop.xlane.xlu0 %207 }
 0x1cf   :  { %v209_v26 = vmul.f32 0.03125, %v208_v25 }
 0x1d1   :  { %v214_v28 = vmul.f32 %v209_v26, %v209_v26  ;;  %v217_v33 = vsub.f32 %v200_v12, %v209_v26 }
 0x1d2   :  { %v212_v27 = vpop.xlane.xlu0 %211 }
 0x1d3   :  { %v213_v29 = vmul.f32 0.03125, %v212_v27 }
 0x1d5   :  { %v215_v30 = vsub.f32 %v213_v29, %v214_v28 }
 0x1d7   :  { %v216_v31 = vmax.f32 %v215_v30, 0.0 }
 0x1d9   :  { %v218_v32 = vadd.f32 1e-05, %v216_v31 }
 0x1db   :  { %660 = vrsqrt.f32 %v218_v32 }
 0x1e5   :  { %v661_v34 = vpop.eup %660 }
 0x1e6   :  { %v220_v36 = vmul.f32 %v661_v34, %v217_v33 }
 0x1e8   :  { %v227_v38 = vmul.f32 %v518_v35, %v220_v36 }
 0x1ea   :  { %v234_v39 = vadd.f32 %v519_v37, %v227_v38 }
 0x1ec   :  { %v235_v40 = vmax.f32 %v234_v39, 0.0 }
 0x1ee   :  { %v236_v41 = vpack.c.bf16 %v235_v40, %v235_v40 }
 0x1f0   :  { %604 = vmatmul.mubr.bf16.vlgmr.msra.gmra.mrb[0].mxu1 %v236_v41 }
 0x2c3   :  { %v342_v43 = vpop.f32.mrb[0].mxu1 }
 0x2c4   :  { %v343_v44 = vadd.f32 %v520_v42, %v342_v43  ;;  %v605_v45 = vpop.f32.mrb[1].mxu1 }
 0x2c5   :  { %v345_v46 = vpop.f32.mrb[2].mxu1 }
 0x2c6   :  { %350 = vadd.xlane.f32.xlu1 %v343_v44  ;;  %v606_v47 = vpop.f32.mrb[3].mxu1  ;;  %v353_v48 = vmul.f32 %v343_v44, %v343_v44 }
 0x2ca   :  { %354 = vadd.xlane.f32.xlu1 %v353_v48 }
 0x353   :  { %v351_v57 = vpop.xlane.xlu1 %350 }
 0x354   :  { %v352_v58 = vmul.f32 0.03125, %v351_v57 }
 0x356   :  { %v357_v60 = vmul.f32 %v352_v58, %v352_v58  ;;  %v360_v2 = vsub.f32 %v343_v44, %v352_v58 }
 0x357   :  { %v355_v59 = vpop.xlane.xlu1 %354 }
 0x358   :  { %v356_v61 = vmul.f32 0.03125, %v355_v59 }
 0x35a   :  { %v358_v62 = vsub.f32 %v356_v61, %v357_v60 }
 0x35c   :  { %v359_v63 = vmax.f32 %v358_v62, 0.0 }
 0x35e   :  { %v361_v1 = vadd.f32 1e-05, %v359_v63 }
 0x360   :  { %662 = vrsqrt.f32 %v361_v1 }
 0x36a   :  { %v663_v3 = vpop.eup %662 }
 0x36b   :  { %v363_v5 = vmul.f32 %v663_v3, %v360_v2 }
 0x36d   :  { %v370_v6 = vmul.f32 %v529_v4, %v363_v5 }
 0x36f   :  { %v377_v7 = vadd.f32 %v530_v0, %v370_v6 }
 0x371   :  { %v378_v8 = vmax.f32 %v377_v7, 0.0 }
 0x373   :  { %v379_v9 = vpack.c.bf16 %v378_v8, %v378_v8 }
 0x375   :  { %624 = vmatmul.mubr.bf16.vlgmr.msra.gmra.mrb[4].mxu0 %v379_v9 }
 0x448   :  { %v485_v11 = vpop.f32.mrb[4].mxu0 }
 0x449   :  { %v486_v12 = vadd.f32 %v531_v10, %v485_v11  ;;  %v625_v13 = vpop.f32.mrb[5].mxu0 }
 0x44a   :  { %v488_v14 = vpop.f32.mrb[6].mxu0 }
 0x44b   :  { %491 = vst [vmem:[#allocation10] sm:$0xff] %v486_v12  ;;  %v626_v15 = vpop.f32.mrb[7].mxu0 }
 0x44c   :  { %763 = shalt.err (!%p760_p8)
}
 0x44d   :  { %s764_s10 = scalar_lea.hbm %s982_s11, 128 }
 0x44e   :  { %p765_p9 = scmp.ne.s32.totalorder %s982_s11, %s764_s10  ;;  %p768_p10 = scmp.lt.u32.totalorder %s764_s10, %s982_s11 }
 0x450   :  { %p770_p11 = pnand %p768_p10, %p765_p9 }
 0x452   :  { %773 = shalt.err (!%p770_p11)
}
 0x453   :  { %501 = dma.vmem_to_hbm [thread:$0]  %s499_s19, 128, %s982_s11, [#allocation4]  }
 0x454   :  { %780 = dma.done.wait [#allocation4], 128  }
 0x455   :  { %781 = vsyncadd [#allocation4], 4294967168 }
 0x456   :  { %505 = vsyncpa [#allocation3], 1 }
 0x457   :  { %506 = vsyncpa [#allocation6], 1 }
 0x458   :  { %507 = vsyncpa [#allocation9], 1 }
 0x459   :  { %508 = vsyncpa [#allocation4], 1 }

</bundles_post_ra>
